<compile_context>
chip_gen: v7x
topology: tpu7x:2x2x1
jax: 0.10.0
libtpu: 0.0.40
codegen_flags: <defaults>
</compile_context>

<pallas_src>
import functools
import math

import jax
import jax.numpy as jnp
from jax.experimental import pallas as pl
from jax.experimental.pallas import tpu as pltpu


def _self_attn_kernel(x_ref, wqkv_ref, bqkv_ref, wo_ref, bo_ref, o_ref, *, heads):
    """One batch-block per grid step: fused QKV projection, per-head softmax
    attention, and the out-projection fused into the head loop."""
    nb, L, D = x_ref.shape
    hd = D // heads
    cdt = x_ref.dtype                                    # MXU-input dtype
    exact = jnp.dtype(cdt) == jnp.dtype(jnp.float32)     # static Python bool

    # (nb, L, D) -> (nb*L, D): leading-dim merge only (no lane movement).
    x = x_ref[...].reshape(nb * L, D)

    # Single fused QKV projection: (nb*L, D) @ (D, 3D), f32 accumulation.
    # Weights are pre-fused, pre-scaled and pre-transposed in the wrapper.
    qkv = (jnp.dot(x, wqkv_ref[...], preferred_element_type=jnp.float32)
           + bqkv_ref[...]).astype(cdt)                  # (nb*L, 3D)

    wo = wo_ref[...]                                     # (D, D), x @ W form
    acc = jnp.zeros((nb * L, D), jnp.float32)            # lane-dense accumulator

    # Per-head attention.  Heads are serialized through `acc`, so the per-head
    # (nb, L, L) f32 score/prob tensors are dead before the next head starts.
    # TODO(synk): for long sequences switch this to an online-softmax KV-tile
    #             loop instead of materializing full (nb, L, L) scores.
    for h in range(heads):
        q0 = h * hd
        qh = qkv[:, q0:q0 + hd].reshape(nb, L, hd)
        kh = qkv[:, D + q0:D + q0 + hd].reshape(nb, L, hd)
        vh = qkv[:, 2 * D + q0:2 * D + q0 + hd].reshape(nb, L, hd)

        s = jnp.einsum('bqd,bkd->bqk', qh, kh,
                       preferred_element_type=jnp.float32)       # (nb, L, L) f32
        s = s - jnp.max(s, axis=-1, keepdims=True)
        p = jnp.exp(s)
        denom = jnp.sum(p, axis=-1, keepdims=True)
        # EUP reciprocal; exact (approx=False) on the f32 verification path.
        p = p * pl.reciprocal(denom, approx=not exact)
        oh = jnp.einsum('bqk,bkd->bqd', p.astype(cdt), vh,
                        preferred_element_type=jnp.float32)      # (nb, L, hd) f32

        # Fused out-projection slice for this head: (nb*L, hd) @ (hd, D).
        # Every accumulator update is D lanes wide (no masked narrow stores).
        acc = acc + jnp.dot(oh.reshape(nb * L, hd).astype(cdt),
                            wo[q0:q0 + hd, :],
                            preferred_element_type=jnp.float32)

    o = acc + bo_ref[...]
    o_ref[...] = o.reshape(nb, L, D).astype(o_ref.dtype)


def _fuse_params(params, heads, compute_dtype):
    """Offline fusion: Linear + MHA in_proj -> one weight; fold q scale; pre-T."""
    D = params["wq"].shape[0]
    scale = 1.0 / math.sqrt(D // heads)

    def fuse(w1, b1, w2, b2):
        # y = (x @ w1.T + b1) @ w2.T + b2 = x @ (w2 @ w1).T + (w2 @ b1 + b2)
        return w2 @ w1, w2 @ b1 + b2

    wq, bq = fuse(params["wq"], params["bq"], params["wqi"], params["bqi"])
    wq, bq = wq * scale, bq * scale                      # fold 1/sqrt(head_dim)
    wk, bk = fuse(params["wk"], params["bk"], params["wki"], params["bki"])
    wv, bv = fuse(params["wv"], params["bv"], params["wvi"], params["bvi"])

    # Pre-transpose so the kernel computes x @ W (no in-kernel transposes),
    # and concatenate Q/K/V along the output dim -> single (D, 3D) matmul.
    wqkv = jnp.concatenate([wq.T, wk.T, wv.T], axis=1)            # (D, 3D)
    bqkv = jnp.concatenate([bq, bk, bv]).reshape(1, 3 * D)        # (1, 3D) f32
    wo = params["wo"].T                                           # (D, D)
    bo = params["bo"].reshape(1, D)                               # (1, D)  f32

    return (wqkv.astype(compute_dtype), bqkv.astype(jnp.float32),
            wo.astype(compute_dtype), bo.astype(jnp.float32))


def _vmem_limit_bytes():
    """Per-generation VMEM budget (review: ~100 MiB v5e/v6e, ~56 MiB v7x)."""
    try:
        cap = pltpu.get_tpu_info().vmem_capacity_bytes
    except Exception:
        cap = 64 * 1024 * 1024                       # conservative (v7x-sized)
    return int(max(32 * 1024 * 1024,
                   min(cap - 8 * 1024 * 1024, 100 * 1024 * 1024)))


def _pick_batch_block(N, L, D, itemsize, vmem_limit_bytes, target_rows=256):
    """Batch-block size: nb*L >= ~256 rows (MXU M-dim fill, grid-overhead
    amortization), bounded by the VMEM budget, N-divisible, and leaving a
    grid of length >= 2 so both v7x TensorCores get work."""
    nb = max(1, min(N, max(1, target_rows // max(L, 1))))

    def step_vmem(nb_):
        rows = nb_ * L
        weights = 4 * D * D * itemsize + 4 * D * 4 * 2          # 1-buf W + biases
        io = 2 * rows * D * itemsize * 2                        # 2-buf x + out blocks
        act = rows * (3 * D) * (4 + itemsize)                   # qkv f32 + cast
        attn = nb_ * L * L * 4 * 2 + rows * D * 4               # scores/probs + acc
        return weights + io + act + attn

    while nb > 1 and step_vmem(nb) > 0.6 * vmem_limit_bytes:
        nb -= 1
    while N % nb:
        nb -= 1
    if N // nb < 2 and N >= 2:                     # >=2 grid steps (dual TC)
        nb = max(1, N // 2)
        while N % nb:
            nb -= 1
    return nb


def self_attn_block_forward(x_lnd, params, heads, compute_dtype=jnp.bfloat16,
                            out_dtype=None):
    """x_lnd: (L, N, D) float32, seq-first like the PyTorch module."""
    L, N, D = x_lnd.shape
    assert D % heads == 0, "embed dim must be divisible by num heads"
    out_dtype = compute_dtype if out_dtype is None else out_dtype
    wqkv, bqkv, wo, bo = _fuse_params(params, heads, compute_dtype)

    # TODO(synk): on v5e fold this layout change + cast into the kernel to
    #             avoid the extra HBM passes (read (L, nb, D) blocks directly).
    x_nld = jnp.transpose(x_lnd, (1, 0, 2)).astype(compute_dtype)   # (N, L, D)

    itemsize = jnp.dtype(compute_dtype).itemsize
    vmem_limit = _vmem_limit_bytes()
    nb = _pick_batch_block(N, L, D, itemsize, vmem_limit)
    grid = (N // nb,)

    flops = (2 * N * L * D * (3 * D)          # fused QKV projection
             + 4 * N * L * L * D              # QK^T and PV over all heads
             + 2 * N * L * D * D)             # out projection
    cost = pl.CostEstimate(
        flops=int(flops),
        transcendentals=int(N * heads * L * L),
        bytes_accessed=int(x_nld.size * itemsize
                           + N * L * D * jnp.dtype(out_dtype).itemsize
                           + (wqkv.size + wo.size) * itemsize
                           + (bqkv.size + bo.size) * 4))

    x_spec = pl.BlockSpec((nb, L, D), lambda b: (b, 0, 0))
    # Resident weights: constant index_map -> single-buffered (a second VMEM
    # copy of a block that never changes is pure waste).
    wqkv_spec = pl.BlockSpec((D, 3 * D), lambda b: (0, 0),
                             pipeline_mode=pl.Buffered(1))
    wo_spec = pl.BlockSpec((D, D), lambda b: (0, 0),
                           pipeline_mode=pl.Buffered(1))
    bqkv_spec = pl.BlockSpec((1, 3 * D), lambda b: (0, 0))
    bo_spec = pl.BlockSpec((1, D), lambda b: (0, 0))

    out = pl.pallas_call(
        functools.partial(_self_attn_kernel, heads=heads),
        out_shape=jax.ShapeDtypeStruct((N, L, D), out_dtype),
        grid_spec=pltpu.PrefetchScalarGridSpec(
            num_scalar_prefetch=0,
            grid=grid,
            in_specs=[x_spec, wqkv_spec, bqkv_spec, wo_spec, bo_spec],
            out_specs=pl.BlockSpec((nb, L, D), lambda b: (b, 0, 0)),
        ),
        compiler_params=pltpu.CompilerParams(
            dimension_semantics=("parallel",),
            vmem_limit_bytes=vmem_limit),
        cost_estimate=cost,
    )(x_nld, wqkv, bqkv, wo, bo)

    return jnp.transpose(out, (1, 0, 2))                 # back to (L, N, D)


def _reference(x_lnd, p, heads):
    """Pure-JAX reference matching PyTorch self_attn_block.forward semantics."""
    L, N, D = x_lnd.shape
    hd = D // heads

    def lin(t, w, b):
        return t @ w.T + b

    q = lin(x_lnd, p["wq"], p["bq"])
    k = lin(x_lnd, p["wk"], p["bk"])
    v = lin(x_lnd, p["wv"], p["bv"])
    q = lin(q, p["wqi"], p["bqi"]) / jnp.sqrt(jnp.float32(hd))
    k = lin(k, p["wki"], p["bki"])
    v = lin(v, p["wvi"], p["bvi"])

    def split(t):  # (L, N, D) -> (N, H, L, hd)
        return jnp.transpose(t.reshape(L, N, heads, hd), (1, 2, 0, 3))

    qh, kh, vh = split(q), split(k), split(v)
    s = jnp.einsum('nhqd,nhkd->nhqk', qh, kh)
    pw = jax.nn.softmax(s, axis=-1)
    o = jnp.einsum('nhqk,nhkd->nhqd', pw, vh)
    o = jnp.transpose(o, (2, 0, 1, 3)).reshape(L, N, D)
    return lin(o, p["wo"], p["bo"])


def _init_params(key, dim):
    names = ["wq", "bq", "wk", "bk", "wv", "bv",
             "wqi", "bqi", "wki", "bki", "wvi", "bvi",
             "wo", "bo"]
    keys = jax.random.split(key, len(names))
    params = {}
    for name, k in zip(names, keys):
        if name.startswith("w"):
            params[name] = jax.random.normal(k, (dim, dim), jnp.float32) * 0.1
        else:
            params[name] = jax.random.normal(k, (dim,), jnp.float32) * 0.1
    return params


if __name__ == "__main__":
    seq_len, batch, dim, heads = 8, 2, 32, 4   # head_dim = 8

    key = jax.random.PRNGKey(0)
    kx, kp = jax.random.split(key)
    x = jax.random.normal(kx, (seq_len, batch, dim), jnp.float32)
    params = _init_params(kp, dim)

    ref = _reference(x, params, heads)

    # f32 compute path: tight numerical check against the reference
    # (exact reciprocal, f32 MXU inputs, f32 output).
    out_f32 = jax.block_until_ready(
        self_attn_block_forward(x, params, heads, compute_dtype=jnp.float32))
    assert out_f32.shape == (seq_len, batch, dim)
    err_f32 = float(jnp.max(jnp.abs(out_f32 - ref)))
    assert err_f32 < 1e-3, f"f32 max err {err_f32}"

    # bf16 MXU path (perf-recommended on v5e/v6e/v7x): bf16 matmul inputs and
    # bf16 output with f32 accumulation/softmax -> looser tolerance by design.
    out_bf16 = jax.block_until_ready(
        self_attn_block_forward(x, params, heads, compute_dtype=jnp.bfloat16))
    assert out_bf16.shape == (seq_len, batch, dim)
    err_bf16 = float(jnp.max(jnp.abs(out_bf16.astype(jnp.float32) - ref)))
    assert err_bf16 < 5e-2, f"bf16 max err {err_bf16}"

    print("KERNEL_OK")
</pallas_src>

<mosaic_0001>
module attributes {stable_mosaic.version = 11 : i64} {
  func.func @_self_attn_kernel(%arg0: i32, %arg1: memref<1x8x32xf32, #tpu.memory_space<vmem>>, %arg2: memref<32x96xf32, #tpu.memory_space<vmem>>, %arg3: memref<1x96xf32, #tpu.memory_space<vmem>>, %arg4: memref<32x32xf32, #tpu.memory_space<vmem>>, %arg5: memref<1x32xf32, #tpu.memory_space<vmem>>, %arg6: memref<1x8x32xf32, #tpu.memory_space<vmem>>) attributes {dimension_semantics = [#tpu.dimension_semantics<parallel>], iteration_bounds = array<i64: 2>, scalar_prefetch = 0 : i64, scratch_operands = 0 : i64, tpu.core_type = #tpu.core_type<tc>, window_params = [{transform_indices = @transform_0, window_bounds = array<i64: 1, 8, 32>}, {pipeline_mode = #tpu.pipeline_mode<synchronous>, transform_indices = @transform_1, window_bounds = array<i64: 32, 96>}, {pipeline_mode = #tpu.pipeline_mode<synchronous>, transform_indices = @transform_2, window_bounds = array<i64: 1, 96>}, {pipeline_mode = #tpu.pipeline_mode<synchronous>, transform_indices = @transform_3, window_bounds = array<i64: 32, 32>}, {pipeline_mode = #tpu.pipeline_mode<synchronous>, transform_indices = @transform_4, window_bounds = array<i64: 1, 32>}, {transform_indices = @transform_5, window_bounds = array<i64: 1, 8, 32>}]} {
    %c0 = arith.constant 0 : index
    %c0_0 = arith.constant 0 : index
    %c0_1 = arith.constant 0 : index
    %0 = vector.load %arg1[%c0, %c0_0, %c0_1] : memref<1x8x32xf32, #tpu.memory_space<vmem>>, vector<1x8x32xf32>
    %1 = vector.shape_cast %0 : vector<1x8x32xf32> to vector<8x32xf32>
    %c0_2 = arith.constant 0 : index
    %c0_3 = arith.constant 0 : index
    %2 = vector.load %arg2[%c0_2, %c0_3] : memref<32x96xf32, #tpu.memory_space<vmem>>, vector<32x96xf32>
    %cst = arith.constant dense<0.000000e+00> : vector<8x96xf32>
    %3 = tpu.matmul %1, %2, %cst {dimension_numbers = #tpu.dot_dimension_numbers<[1], [0], [0], [1], [0, 0, 1, 1], [], []>} : vector<8x32xf32>, vector<32x96xf32>, vector<8x96xf32> -> vector<8x96xf32>
    %c0_4 = arith.constant 0 : index
    %c0_5 = arith.constant 0 : index
    %4 = vector.load %arg3[%c0_4, %c0_5] : memref<1x96xf32, #tpu.memory_space<vmem>>, vector<1x96xf32>
    %5 = vector.broadcast %4 : vector<1x96xf32> to vector<8x96xf32>
    %6 = arith.addf %3, %5 : vector<8x96xf32>
    %c0_6 = arith.constant 0 : index
    %c0_7 = arith.constant 0 : index
    %7 = vector.load %arg4[%c0_6, %c0_7] : memref<32x32xf32, #tpu.memory_space<vmem>>, vector<32x32xf32>
    %cst_8 = arith.constant 0.000000e+00 : f32
    %8 = vector.broadcast %cst_8 : f32 to vector<8x32xf32>
    %9 = vector.extract_strided_slice %6 {offsets = [0, 0], sizes = [8, 8], strides = [1, 1]} : vector<8x96xf32> to vector<8x8xf32>
    %10 = vector.shape_cast %9 : vector<8x8xf32> to vector<1x8x8xf32>
    %11 = vector.extract_strided_slice %6 {offsets = [0, 32], sizes = [8, 8], strides = [1, 1]} : vector<8x96xf32> to vector<8x8xf32>
    %12 = vector.shape_cast %11 : vector<8x8xf32> to vector<1x8x8xf32>
    %13 = vector.extract_strided_slice %6 {offsets = [0, 64], sizes = [8, 8], strides = [1, 1]} : vector<8x96xf32> to vector<8x8xf32>
    %14 = vector.shape_cast %13 : vector<8x8xf32> to vector<1x8x8xf32>
    "tpu.trace_start"() <{level = 10 : i32, message = "bqd,bkd->bqk"}> : () -> ()
    %cst_9 = arith.constant dense<0.000000e+00> : vector<1x8x8xf32>
    %15 = tpu.matmul %10, %12, %cst_9 {dimension_numbers = #tpu.dot_dimension_numbers<[2], [2], [1], [1], [0, 0, 0, 1, 1, 1], [0], [0]>} : vector<1x8x8xf32>, vector<1x8x8xf32>, vector<1x8x8xf32> -> vector<1x8x8xf32>
    "tpu.trace_stop"() : () -> ()
    %cst_10 = arith.constant dense<0xFF800000> : vector<1x8xf32>
    %16 = vector.multi_reduction <maximumf>, %15, %cst_10 [2] : vector<1x8x8xf32> to vector<1x8xf32>
    %17 = vector.shape_cast %16 : vector<1x8xf32> to vector<1x8x1xf32>
    %18 = vector.broadcast %17 : vector<1x8x1xf32> to vector<1x8x8xf32>
    %19 = arith.subf %15, %18 : vector<1x8x8xf32>
    %20 = math.exp %19 : vector<1x8x8xf32>
    %cst_11 = arith.constant dense<0.000000e+00> : vector<1x8xf32>
    %21 = vector.multi_reduction <add>, %20, %cst_11 [2] : vector<1x8x8xf32> to vector<1x8xf32>
    %22 = vector.shape_cast %21 : vector<1x8xf32> to vector<1x8x1xf32>
    %23 = tpu.reciprocal %22 : vector<1x8x1xf32> -> vector<1x8x1xf32>
    %24 = vector.broadcast %23 : vector<1x8x1xf32> to vector<1x8x8xf32>
    %25 = arith.mulf %20, %24 : vector<1x8x8xf32>
    "tpu.trace_start"() <{level = 10 : i32, message = "bqk,bkd->bqd"}> : () -> ()
    %cst_12 = arith.constant dense<0.000000e+00> : vector<1x8x8xf32>
    %26 = tpu.matmul %25, %14, %cst_12 {dimension_numbers = #tpu.dot_dimension_numbers<[2], [1], [1], [2], [0, 0, 0, 1, 1, 2], [0], [0]>} : vector<1x8x8xf32>, vector<1x8x8xf32>, vector<1x8x8xf32> -> vector<1x8x8xf32>
    "tpu.trace_stop"() : () -> ()
    %27 = vector.shape_cast %26 : vector<1x8x8xf32> to vector<8x8xf32>
    %28 = vector.extract_strided_slice %7 {offsets = [0, 0], sizes = [8, 32], strides = [1, 1]} : vector<32x32xf32> to vector<8x32xf32>
    %cst_13 = arith.constant dense<0.000000e+00> : vector<8x32xf32>
    %29 = tpu.matmul %27, %28, %cst_13 {dimension_numbers = #tpu.dot_dimension_numbers<[1], [0], [0], [1], [0, 0, 1, 1], [], []>} : vector<8x8xf32>, vector<8x32xf32>, vector<8x32xf32> -> vector<8x32xf32>
    %30 = arith.addf %8, %29 : vector<8x32xf32>
    %31 = vector.extract_strided_slice %6 {offsets = [0, 8], sizes = [8, 8], strides = [1, 1]} : vector<8x96xf32> to vector<8x8xf32>
    %32 = vector.shape_cast %31 : vector<8x8xf32> to vector<1x8x8xf32>
    %33 = vector.extract_strided_slice %6 {offsets = [0, 40], sizes = [8, 8], strides = [1, 1]} : vector<8x96xf32> to vector<8x8xf32>
    %34 = vector.shape_cast %33 : vector<8x8xf32> to vector<1x8x8xf32>
    %35 = vector.extract_strided_slice %6 {offsets = [0, 72], sizes = [8, 8], strides = [1, 1]} : vector<8x96xf32> to vector<8x8xf32>
    %36 = vector.shape_cast %35 : vector<8x8xf32> to vector<1x8x8xf32>
    "tpu.trace_start"() <{level = 10 : i32, message = "bqd,bkd->bqk"}> : () -> ()
    %cst_14 = arith.constant dense<0.000000e+00> : vector<1x8x8xf32>
    %37 = tpu.matmul %32, %34, %cst_14 {dimension_numbers = #tpu.dot_dimension_numbers<[2], [2], [1], [1], [0, 0, 0, 1, 1, 1], [0], [0]>} : vector<1x8x8xf32>, vector<1x8x8xf32>, vector<1x8x8xf32> -> vector<1x8x8xf32>
    "tpu.trace_stop"() : () -> ()
    %cst_15 = arith.constant dense<0xFF800000> : vector<1x8xf32>
    %38 = vector.multi_reduction <maximumf>, %37, %cst_15 [2] : vector<1x8x8xf32> to vector<1x8xf32>
    %39 = vector.shape_cast %38 : vector<1x8xf32> to vector<1x8x1xf32>
    %40 = vector.broadcast %39 : vector<1x8x1xf32> to vector<1x8x8xf32>
    %41 = arith.subf %37, %40 : vector<1x8x8xf32>
    %42 = math.exp %41 : vector<1x8x8xf32>
    %cst_16 = arith.constant dense<0.000000e+00> : vector<1x8xf32>
    %43 = vector.multi_reduction <add>, %42, %cst_16 [2] : vector<1x8x8xf32> to vector<1x8xf32>
    %44 = vector.shape_cast %43 : vector<1x8xf32> to vector<1x8x1xf32>
    %45 = tpu.reciprocal %44 : vector<1x8x1xf32> -> vector<1x8x1xf32>
    %46 = vector.broadcast %45 : vector<1x8x1xf32> to vector<1x8x8xf32>
    %47 = arith.mulf %42, %46 : vector<1x8x8xf32>
    "tpu.trace_start"() <{level = 10 : i32, message = "bqk,bkd->bqd"}> : () -> ()
    %cst_17 = arith.constant dense<0.000000e+00> : vector<1x8x8xf32>
    %48 = tpu.matmul %47, %36, %cst_17 {dimension_numbers = #tpu.dot_dimension_numbers<[2], [1], [1], [2], [0, 0, 0, 1, 1, 2], [0], [0]>} : vector<1x8x8xf32>, vector<1x8x8xf32>, vector<1x8x8xf32> -> vector<1x8x8xf32>
    "tpu.trace_stop"() : () -> ()
    %49 = vector.shape_cast %48 : vector<1x8x8xf32> to vector<8x8xf32>
    %50 = vector.extract_strided_slice %7 {offsets = [8, 0], sizes = [8, 32], strides = [1, 1]} : vector<32x32xf32> to vector<8x32xf32>
    %cst_18 = arith.constant dense<0.000000e+00> : vector<8x32xf32>
    %51 = tpu.matmul %49, %50, %cst_18 {dimension_numbers = #tpu.dot_dimension_numbers<[1], [0], [0], [1], [0, 0, 1, 1], [], []>} : vector<8x8xf32>, vector<8x32xf32>, vector<8x32xf32> -> vector<8x32xf32>
    %52 = arith.addf %30, %51 : vector<8x32xf32>
    %53 = vector.extract_strided_slice %6 {offsets = [0, 16], sizes = [8, 8], strides = [1, 1]} : vector<8x96xf32> to vector<8x8xf32>
    %54 = vector.shape_cast %53 : vector<8x8xf32> to vector<1x8x8xf32>
    %55 = vector.extract_strided_slice %6 {offsets = [0, 48], sizes = [8, 8], strides = [1, 1]} : vector<8x96xf32> to vector<8x8xf32>
    %56 = vector.shape_cast %55 : vector<8x8xf32> to vector<1x8x8xf32>
    %57 = vector.extract_strided_slice %6 {offsets = [0, 80], sizes = [8, 8], strides = [1, 1]} : vector<8x96xf32> to vector<8x8xf32>
    %58 = vector.shape_cast %57 : vector<8x8xf32> to vector<1x8x8xf32>
    "tpu.trace_start"() <{level = 10 : i32, message = "bqd,bkd->bqk"}> : () -> ()
    %cst_19 = arith.constant dense<0.000000e+00> : vector<1x8x8xf32>
    %59 = tpu.matmul %54, %56, %cst_19 {dimension_numbers = #tpu.dot_dimension_numbers<[2], [2], [1], [1], [0, 0, 0, 1, 1, 1], [0], [0]>} : vector<1x8x8xf32>, vector<1x8x8xf32>, vector<1x8x8xf32> -> vector<1x8x8xf32>
    "tpu.trace_stop"() : () -> ()
    %cst_20 = arith.constant dense<0xFF800000> : vector<1x8xf32>
    %60 = vector.multi_reduction <maximumf>, %59, %cst_20 [2] : vector<1x8x8xf32> to vector<1x8xf32>
    %61 = vector.shape_cast %60 : vector<1x8xf32> to vector<1x8x1xf32>
    %62 = vector.broadcast %61 : vector<1x8x1xf32> to vector<1x8x8xf32>
    %63 = arith.subf %59, %62 : vector<1x8x8xf32>
    %64 = math.exp %63 : vector<1x8x8xf32>
    %cst_21 = arith.constant dense<0.000000e+00> : vector<1x8xf32>
    %65 = vector.multi_reduction <add>, %64, %cst_21 [2] : vector<1x8x8xf32> to vector<1x8xf32>
    %66 = vector.shape_cast %65 : vector<1x8xf32> to vector<1x8x1xf32>
    %67 = tpu.reciprocal %66 : vector<1x8x1xf32> -> vector<1x8x1xf32>
    %68 = vector.broadcast %67 : vector<1x8x1xf32> to vector<1x8x8xf32>
    %69 = arith.mulf %64, %68 : vector<1x8x8xf32>
    "tpu.trace_start"() <{level = 10 : i32, message = "bqk,bkd->bqd"}> : () -> ()
    %cst_22 = arith.constant dense<0.000000e+00> : vector<1x8x8xf32>
    %70 = tpu.matmul %69, %58, %cst_22 {dimension_numbers = #tpu.dot_dimension_numbers<[2], [1], [1], [2], [0, 0, 0, 1, 1, 2], [0], [0]>} : vector<1x8x8xf32>, vector<1x8x8xf32>, vector<1x8x8xf32> -> vector<1x8x8xf32>
    "tpu.trace_stop"() : () -> ()
    %71 = vector.shape_cast %70 : vector<1x8x8xf32> to vector<8x8xf32>
    %72 = vector.extract_strided_slice %7 {offsets = [16, 0], sizes = [8, 32], strides = [1, 1]} : vector<32x32xf32> to vector<8x32xf32>
    %cst_23 = arith.constant dense<0.000000e+00> : vector<8x32xf32>
    %73 = tpu.matmul %71, %72, %cst_23 {dimension_numbers = #tpu.dot_dimension_numbers<[1], [0], [0], [1], [0, 0, 1, 1], [], []>} : vector<8x8xf32>, vector<8x32xf32>, vector<8x32xf32> -> vector<8x32xf32>
    %74 = arith.addf %52, %73 : vector<8x32xf32>
    %75 = vector.extract_strided_slice %6 {offsets = [0, 24], sizes = [8, 8], strides = [1, 1]} : vector<8x96xf32> to vector<8x8xf32>
    %76 = vector.shape_cast %75 : vector<8x8xf32> to vector<1x8x8xf32>
    %77 = vector.extract_strided_slice %6 {offsets = [0, 56], sizes = [8, 8], strides = [1, 1]} : vector<8x96xf32> to vector<8x8xf32>
    %78 = vector.shape_cast %77 : vector<8x8xf32> to vector<1x8x8xf32>
    %79 = vector.extract_strided_slice %6 {offsets = [0, 88], sizes = [8, 8], strides = [1, 1]} : vector<8x96xf32> to vector<8x8xf32>
    %80 = vector.shape_cast %79 : vector<8x8xf32> to vector<1x8x8xf32>
    "tpu.trace_start"() <{level = 10 : i32, message = "bqd,bkd->bqk"}> : () -> ()
    %cst_24 = arith.constant dense<0.000000e+00> : vector<1x8x8xf32>
    %81 = tpu.matmul %76, %78, %cst_24 {dimension_numbers = #tpu.dot_dimension_numbers<[2], [2], [1], [1], [0, 0, 0, 1, 1, 1], [0], [0]>} : vector<1x8x8xf32>, vector<1x8x8xf32>, vector<1x8x8xf32> -> vector<1x8x8xf32>
    "tpu.trace_stop"() : () -> ()
    %cst_25 = arith.constant dense<0xFF800000> : vector<1x8xf32>
    %82 = vector.multi_reduction <maximumf>, %81, %cst_25 [2] : vector<1x8x8xf32> to vector<1x8xf32>
    %83 = vector.shape_cast %82 : vector<1x8xf32> to vector<1x8x1xf32>
    %84 = vector.broadcast %83 : vector<1x8x1xf32> to vector<1x8x8xf32>
    %85 = arith.subf %81, %84 : vector<1x8x8xf32>
    %86 = math.exp %85 : vector<1x8x8xf32>
    %cst_26 = arith.constant dense<0.000000e+00> : vector<1x8xf32>
    %87 = vector.multi_reduction <add>, %86, %cst_26 [2] : vector<1x8x8xf32> to vector<1x8xf32>
    %88 = vector.shape_cast %87 : vector<1x8xf32> to vector<1x8x1xf32>
    %89 = tpu.reciprocal %88 : vector<1x8x1xf32> -> vector<1x8x1xf32>
    %90 = vector.broadcast %89 : vector<1x8x1xf32> to vector<1x8x8xf32>
    %91 = arith.mulf %86, %90 : vector<1x8x8xf32>
    "tpu.trace_start"() <{level = 10 : i32, message = "bqk,bkd->bqd"}> : () -> ()
    %cst_27 = arith.constant dense<0.000000e+00> : vector<1x8x8xf32>
    %92 = tpu.matmul %91, %80, %cst_27 {dimension_numbers = #tpu.dot_dimension_numbers<[2], [1], [1], [2], [0, 0, 0, 1, 1, 2], [0], [0]>} : vector<1x8x8xf32>, vector<1x8x8xf32>, vector<1x8x8xf32> -> vector<1x8x8xf32>
    "tpu.trace_stop"() : () -> ()
    %93 = vector.shape_cast %92 : vector<1x8x8xf32> to vector<8x8xf32>
    %94 = vector.extract_strided_slice %7 {offsets = [24, 0], sizes = [8, 32], strides = [1, 1]} : vector<32x32xf32> to vector<8x32xf32>
    %cst_28 = arith.constant dense<0.000000e+00> : vector<8x32xf32>
    %95 = tpu.matmul %93, %94, %cst_28 {dimension_numbers = #tpu.dot_dimension_numbers<[1], [0], [0], [1], [0, 0, 1, 1], [], []>} : vector<8x8xf32>, vector<8x32xf32>, vector<8x32xf32> -> vector<8x32xf32>
    %96 = arith.addf %74, %95 : vector<8x32xf32>
    %c0_29 = arith.constant 0 : index
    %c0_30 = arith.constant 0 : index
    %97 = vector.load %arg5[%c0_29, %c0_30] : memref<1x32xf32, #tpu.memory_space<vmem>>, vector<1x32xf32>
    %98 = vector.broadcast %97 : vector<1x32xf32> to vector<8x32xf32>
    %99 = arith.addf %96, %98 : vector<8x32xf32>
    %100 = vector.shape_cast %99 : vector<8x32xf32> to vector<1x8x32xf32>
    %c0_31 = arith.constant 0 : index
    %c0_32 = arith.constant 0 : index
    %c0_33 = arith.constant 0 : index
    %101 = vector.load %arg6[%c0_31, %c0_32, %c0_33] : memref<1x8x32xf32, #tpu.memory_space<vmem>>, vector<1x8x32xf32>
    tpu.vector_store %arg6[%c0_31, %c0_32, %c0_33], %100 {strides = array<i32>} : memref<1x8x32xf32, #tpu.memory_space<vmem>>, vector<1x8x32xf32>,
    return
  }
  func.func @transform_0(%arg0: i32) -> (i32, i32, i32) {
    %c0_i32 = arith.constant 0 : i32
    %c0_i32_0 = arith.constant 0 : i32
    %c0_i32_1 = arith.constant 0 : i32
    return %arg0, %c0_i32, %c0_i32_0 : i32, i32, i32
  }
  func.func @transform_1(%arg0: i32) -> (i32, i32) {
    %c0_i32 = arith.constant 0 : i32
    %c0_i32_0 = arith.constant 0 : i32
    %c0_i32_1 = arith.constant 0 : i32
    return %c0_i32, %c0_i32_0 : i32, i32
  }
  func.func @transform_2(%arg0: i32) -> (i32, i32) {
    %c0_i32 = arith.constant 0 : i32
    %c0_i32_0 = arith.constant 0 : i32
    %c0_i32_1 = arith.constant 0 : i32
    return %c0_i32, %c0_i32_0 : i32, i32
  }
  func.func @transform_3(%arg0: i32) -> (i32, i32) {
    %c0_i32 = arith.constant 0 : i32
    %c0_i32_0 = arith.constant 0 : i32
    %c0_i32_1 = arith.constant 0 : i32
    return %c0_i32, %c0_i32_0 : i32, i32
  }
  func.func @transform_4(%arg0: i32) -> (i32, i32) {
    %c0_i32 = arith.constant 0 : i32
    %c0_i32_0 = arith.constant 0 : i32
    %c0_i32_1 = arith.constant 0 : i32
    return %c0_i32, %c0_i32_0 : i32, i32
  }
  func.func @transform_5(%arg0: i32) -> (i32, i32, i32) {
    %c0_i32 = arith.constant 0 : i32
    %c0_i32_0 = arith.constant 0 : i32
    %c0_i32_1 = arith.constant 0 : i32
    return %arg0, %c0_i32, %c0_i32_0 : i32, i32, i32
  }
}

</mosaic_0001>

<bundles_post_ra>
// kernel: tpu_custom_call.1
= control target key start
LH: loop header
LB: loop body
LE: loop exit
PB: predicated region body
PF: predicated region fallthrough
CT: control target
= control target key end

     0   :  { %10 = vsyncpa [#allocation3], 0  ;;  %s2190_s0 = inlined_call_operand.hbm [shape: f32[2,8,32], index: 0, kind: input, shape index: {}]   ;;  %s2191_s1 = inlined_call_operand.hbm [shape: f32[32,96], index: 1, kind: input, shape index: {}]   ;;  %s2192_s2 = inlined_call_operand.vmem [shape: f32[1,96], index: 2, kind: input, shape index: {}]   ;;  %s2193_s3 = inlined_call_operand.hbm [shape: f32[32,32], index: 3, kind: input, shape index: {}]   ;;  %s2194_s4 = inlined_call_operand.vmem [shape: f32[1,32], index: 4, kind: input, shape index: {}]   ;;  %s2195_s5 = inlined_call_operand.hbm [shape: f32[2,8,32], index: 5, kind: output, shape index: {}]  }
   0x1   :  { %12 = vsyncpa [#allocation3 + $0x1], 0 }
   0x2   :  { %13 = vsyncpa [#allocation6], 0 }
   0x3   :  { %14 = vsyncpa [#allocation4], 0 }
   0x4   :  { %16 = vsyncpa [#allocation4 + $0x1], 0  ;;  %s1873_s18 = smov 0   ;;  %s1875_s19 = smov 0  }
   0x5   :  { %s1877_s20 = smov 0   ;;  %s1879_s21 = smov 0  }
   0x6 LB: > { %s1894_s22 = sadd.s32 4294967295, %s1821_s21   ;;  %s1425_s23 = sadd.s32 4294967294, %s1821_s21   ;;  %s1821_s21 = sphi %s1879_s21, %s2215_s21   ;;  %s1817_s20 = sphi %s1877_s20, %s2214_s20   ;;  %s1813_s19 = sphi %s1875_s19, %s2213_s19   ;;  %s1809_s18 = sphi %s1873_s18, %s2212_s18  }
   0x7   : > { %p42_p0 = scmp.ne.s32.totalorder %s1813_s19, %s1809_s18  ;;  %p2196_p1 = scmp.eq.s32.totalorder %s1894_s22, 0 }
   0x8   : > { %p156_p3 = scmp.eq.s32.totalorder %s1425_s23, 1  ;;  %p1426_p5 = scmp.ge.s32.totalorder %s1821_s21, 1 }
   0x9   : > { %p1903_p4 = por %p2196_p1, %p42_p0  ;;  %p163_p7 = scmp.lt.s32.totalorder %s1821_s21, 3 }
   0xa   : > { %p1908_p6 = por %p156_p3, %p42_p0  ;;  %s1823_s27 = smov [#allocation5]  }
   0xb   : > { %s2199_s24 = scalar_select %p1903_p4, 1, 0 }
   0xc   : > { %s2200_s25 = scalar_select %p1908_p6, 1, 0 }
   0xd   : > { %p1913_p8 = pnand %p1426_p5, %p163_p7  ;;  %s175_s28 = sshll.u32 %s1823_s27, 4  ;;  %s1917_s28 = int_to_ptr.vmem [resolvable:$true] %s175_s28 }
   0xe   : > { %s1824_s30 = smov [#allocation7]   ;;  %s1665_s9 = scalar_lea.hbm %s2191_s1, 512 }
   0xf   : > { %p1578_p9 = pneg %p1913_p8  ;;  %s191_s6 = sshll.u32 %s1824_s30, 4  ;;  %s1928_s6 = int_to_ptr.vmem [resolvable:$true] %s191_s6 }
  0x10   : > { %p1666_p12 = scmp.ne.s32.totalorder %s2191_s1, %s1665_s9  ;;  %p1672_p5 = scmp.lt.u32.totalorder %s1665_s9, %s2191_s1 }
  0x11   : > { %p1924_p11 = pnand %p1578_p9, %p2196_p1 }
  0x13   : > { %p1667_p13 = pneg %p1924_p11 }
  0x15   : > { %p1668_p0 = pnand %p1667_p13, %p1666_p12 }
  0x17   : > { %p1669_p3 = pneg %p1668_p0 }
  0x19   : > { %p1674_p7 = pnand %p1672_p5, %p1669_p3 }
  0x1b   : > { %1677 = shalt.err (!%p1674_p7)
}
  0x1c   : > { %s1678_s14 = scalar_lea.vmem %s1917_s28, 512  ;;  %p1686_p2 = scmp.lt.s32.totalorder %s1917_s28, %s1917_s28 }
  0x1d   : > { %p1679_p9 = scmp.ne.s32.totalorder %s1917_s28, %s1678_s14  ;;  %p1687_p12 = scmp.lt.s32.totalorder %s1678_s14, %s1678_s14 }
  0x1f   : > { %p1681_p10 = pnand %p1679_p9, %p1667_p13  ;;  %p1688_p0 = por %p1687_p12, %p1686_p2 }
  0x21   : > { %p1682_p1 = pneg %p1681_p10 }
  0x23   : > { %p1689_p6 = pnand %p1688_p0, %p1682_p1 }
  0x25   : > { %1692 = shalt.err (!%p1689_p6)
}
  0x26   : > { %s1825_s15 = smov 128   ;;  %s1826_s16 = smov 8  }
  0x27   : > { %1581 = dma.hbm_to_vmem [thread:$0]  (!%p1924_p11), %s2191_s1, 512, %s1917_s28, [#allocation6], %s1825_s15, %s1825_s15, %s1826_s16  }
  0x28   : > { %s1693_s7 = scalar_lea.hbm %s2193_s3, 512 }
  0x29   : > { %p1694_p2 = scmp.ne.s32.totalorder %s2193_s3, %s1693_s7  ;;  %p1700_p10 = scmp.lt.u32.totalorder %s1693_s7, %s2193_s3 }
  0x2b   : > { %p1696_p1 = pnand %p1694_p2, %p1667_p13 }
  0x2d   : > { %p1697_p6 = pneg %p1696_p1 }
  0x2f   : > { %p1702_p3 = pnand %p1700_p10, %p1697_p6 }
  0x31   : > { %1705 = shalt.err (!%p1702_p3)
}
  0x32   : > { %s1706_s28 = scalar_lea.vmem %s1928_s6, 512  ;;  %p1714_p12 = scmp.lt.s32.totalorder %s1928_s6, %s1928_s6 }
  0x33   : > { %p1707_p5 = scmp.ne.s32.totalorder %s1928_s6, %s1706_s28  ;;  %p1715_p0 = scmp.lt.s32.totalorder %s1706_s28, %s1706_s28 }
  0x35   : > { %p1709_p7 = pnand %p1707_p5, %p1667_p13  ;;  %p1716_p2 = por %p1715_p0, %p1714_p12 }
  0x37   : > { %p1710_p9 = pneg %p1709_p7 }
  0x39   : > { %p1717_p1 = pnand %p1716_p2, %p1710_p9 }
  0x3b   : > { %1720 = shalt.err (!%p1717_p1)
}
  0x3c   : > { %1584 = dma.hbm_to_vmem [thread:$0]  (!%p1924_p11), %s2193_s3, 512, %s1928_s6, [#allocation6], %s1825_s15, %s1825_s15, %s1826_s16  }
  0x3d   : > { %s1983_s14 = sadd.s32 1, %s1821_s21   ;;  %s29_s29 = sadd.s32 1, %s1817_s20 }
  0x3e   : > { %s26_s17 = ssub.s32 %s1821_s21, %s1983_s14  ;;  %p36_p13 = scmp.ne.s32.totalorder %s1817_s20, %s1813_s19 }
  0x3f   : > { %p27_p6 = scmp.eq.s32.totalorder %s26_s17, 0  ;;  %p37_p10 = scmp.eq.s32.totalorder %s1821_s21, 0 }
  0x40   : > { %p2203_p3 = scmp.eq.s32.totalorder %s1894_s22, 1  ;;  %p1595_p7 = scmp.lt.s32.totalorder %s1821_s21, 2 }
  0x41   : > { %s1999_s27 = scalar_select %p27_p6, %s1817_s20, %s29_s29  }
  0x42   : > { %p1993_p5 = por %p2203_p3, %p36_p13  ;;  %p38_p9 = por %p37_p10, %p36_p13 }
  0x43   : > { %s208_s30 = sand.u32 1, %s1817_s20   ;;  %s1431_s6 = sshll.u32 %s1821_s21, 7 }
  0x44   : > { %s2204_s23 = scalar_select %p1993_p5, 1, 0 }
  0x45   : > { %s1430_s7 = sshll.u32 %s208_s30, 3  ;;  %s2006_s8 = scalar_lea.hbm %s2190_s0, %s1431_s6 }
  0x46   : > { %s212_s9 = scalar_lea.vmem [#allocation2], %s1430_s7  ;;  %p2010_p11 = pnand %p1595_p7, %p38_p9 }
  0x47   : > { %s219_s10 = sshll.u32 %s212_s9, 4  ;;  %s209_s28 = scalar_lea.sflag [#allocation3], %s208_s30  ;;  %s2008_s10 = int_to_ptr.vmem [resolvable:$true] %s219_s10 }
  0x48   : > { %s1721_s12 = scalar_lea.hbm %s2006_s8, 128  ;;  %p1723_p0 = pneg %p2010_p11 }
  0x49   : > { %p1722_p12 = scmp.ne.s32.totalorder %s2006_s8, %s1721_s12  ;;  %s1726_s17 = scalar_lea.hbm %s2190_s0, 256 }
  0x4a   : > { %p1727_p13 = scmp.lt.u32.totalorder %s2006_s8, %s2190_s0  ;;  %p1728_p6 = scmp.lt.u32.totalorder %s1726_s17, %s1721_s12 }
  0x4b   : > { %p1724_p2 = pnand %p1723_p0, %p1722_p12  ;;  %p1730_p3 = scmp.lt.u32.totalorder %s1721_s12, %s2006_s8 }
  0x4c   : > { %p1729_p10 = por %p1728_p6, %p1727_p13 }
  0x4d   : > { %p1725_p1 = pneg %p1724_p2 }
  0x4e   : > { %p1731_p7 = por %p1730_p3, %p1729_p10 }
  0x50   : > { %p1732_p9 = pnand %p1731_p7, %p1725_p1 }
  0x52   : > { %1735 = shalt.err (!%p1732_p9)
}
  0x53   : > { %s1736_s30 = scalar_lea.vmem %s2008_s10, 128  ;;  %s1827_s15 = smov [#allocation2]  }
  0x54   : > { %p1737_p12 = scmp.ne.s32.totalorder %s2008_s10, %s1736_s30  ;;  %s1741_s16 = sshll.u32 %s1827_s15, 4  ;;  %s1742_s16 = int_to_ptr.vmem [resolvable:$false] %s1741_s16 }
  0x55   : > { %s1743_s9 = scalar_lea.vmem %s1742_s16, 256  ;;  %p1744_p4 = scmp.lt.s32.totalorder %s2008_s10, %s1742_s16 }
  0x56   : > { %p1739_p2 = pnand %p1737_p12, %p1723_p0  ;;  %p1745_p13 = scmp.lt.s32.totalorder %s1743_s9, %s1736_s30 }
  0x58   : > { %p1740_p5 = pneg %p1739_p2  ;;  %p1746_p6 = por %p1745_p13, %p1744_p4 }
  0x5a   : > { %p1747_p10 = pnand %p1746_p6, %p1740_p5 }
  0x5c   : > { %1750 = shalt.err (!%p1747_p10)
}
  0x5d   : > { %1588 = dma.hbm_to_vmem [thread:$0]  (!%p2010_p11), %s2006_s8, 128, %s2008_s10, %s209_s28  }
  0x5e   : > { %228 = sbr.rel (%p1913_p8) target bundleno = 2691 (0xa83), region = 40  ;;  %s2042_s12 = sand.u32 (!%p1913_p8), 1, %s1813_s19  }
  0x5f   : > { %s1433_s13 = sshll.u32 (!%p1913_p8), %s2042_s12, 3  ;;  %s231_s29 = scalar_lea.sflag (!%p1913_p8), [#allocation3], %s2042_s12 }
  0x60   : > { %s234_s17 = scalar_lea.vmem (!%p1913_p8), [#allocation2], %s1433_s13  ;;  %p2206_p4 = scmp.ne.s32.totalorder (!%p1913_p8), %s2199_s24, 0 }
  0x65   : > { %1796 = dma.done.wait (%p2206_p4), %s231_s29, 128  }
  0x66   : > { %1798 = vsyncadd (%p2206_p4), %s231_s29, 4294967168  ;;  %p2207_p5 = scmp.eq.s32.totalorder %s1894_s22, 0 }
  0x68   : > { %1800 = dma.done.wait (%p2207_p5), [#allocation6], 1024   ;;  %p2208_p8 = pmov %p2207_p5 }
  0x69   : > { %v1828_v0 = vmov 0.0|0.0   ;;  %vm1829_vm0 = vmmov 0   ;;  %v1830_v1 = vmov 0.0   ;;  %v270_v2 = vld [vmem:[#allocation5] sm:$0xff]  ;;  %v271_v3 = vld [vmem:[#allocation5 + $0x8] sm:$0xff]  ;;  %v272_v4 = vld [vmem:[#allocation5 + $0x10] sm:$0xff] }
  0x6a   : > { %1802 = vsyncadd (%p2208_p8), [#allocation6], 4294966272  ;;  %1560 = vmatprep.subr.bf16.mxu0 %v1828_v0  ;;  %1497 = vmatprep.mubr.msk.f32.mxu0 %vm1829_vm0, %v1830_v1  ;;  %v1561_v5 = vpack.c.bf16 %v271_v3, %v270_v2  ;;  %v273_v6 = vld [vmem:[#allocation5 + $0x18] sm:$0xff]  ;;  %vm281_vm1 = vcmask 261120   ;;  %v1437_v9 = vld [vmem:[%s2192_s2] ss:$0 sm:$0xff] }
  0x6b   : > { %1500 = vmatprep.subr.mxu1 %v1830_v1  ;;  %1502 = vmatprep.mubr.msk.f32.mxu1 %vm1829_vm0, %v1830_v1  ;;  %v1564_v7 = vpack.c.bf16 %v273_v6, %v272_v4  ;;  %v269_v8 = vld [vmem:[%s234_s17] sm:$0xff]  ;;  %s1831_s8 = smov 120   ;;  %s1832_s10 = smov 96   ;;  %vm362_vm2 = vcmask 64512   ;;  %v356_v32 = vld [vmem:[#allocation7 + $0x8] sm:$0xff]  ;;  %v355_v41 = vld [vmem:[#allocation7] sm:$0xff] }
  0x6c   : > { %1562 = vmatpush3.bf16.msra.mxu0 %v1561_v5  ;;  %s1833_s11 = smov 88   ;;  %s1834_s28 = smov 56   ;;  %v357_v4 = vld [vmem:[#allocation7 + $0x10] sm:$0xff] }
  0x6d   : > { %1563 = vmatprep.subr.bf16.mxu0 %v1828_v0  ;;  %s1835_s7 = smov 64   ;;  %s1836_s6 = smov 80  }
  0x6e   : > { %s1837_s30 = smov 112   ;;  %s1838_s15 = smov 72  }
  0x6f   : > { %s1839_s16 = smov 104   ;;  %s1840_s9 = smov 48  }
  0x70   : > { %1565 = vmatpush3.bf16.msra.mxu0 %v1564_v7  ;;  %s1841_s29 = smov 40   ;;  %s1457_s26 = sshll.u32 %s1894_s22, 7 }
  0x71   : > { %1510 = vmatprep.subr.mxu0 %v1830_v1  ;;  %p2209_p0 = scmp.ne.s32.totalorder %s2204_s23, 0 }
  0x73   : > { %1498 = vmatmul.mubr.msk.f32.vlgmr.msra.gmra.mrb[0].mxu0 %vm281_vm1, %v269_v8 }
  0x74   : > { %1512 = vmatprep.mubr.msk.f32.mxu0 %vm1829_vm0, %v1830_v1 }
 0x146   : > { %v351_v10 = vpop.f32.mrb[0].mxu0 }
 0x147   : > { %v2068_v11 = vadd.f32 %v1437_v9, %v351_v10  ;;  %v1499_v12 = vpop.f32.mrb[1].mxu0 }
 0x149   : > { %524 = vrot.lane.b32.xlu1 %v2068_v11, %s1831_s8  ;;  %360 = vrot.lane.b32.xlu0 %v2068_v11, %s1832_s10  ;;  %s268_s8 = scalar_lea.vmem [#allocation8], %s1433_s13  ;;  %s1842_s13 = smov [#allocation8]  }
 0x14a   : > { %s1336_s10 = sshll.u32 %s268_s8, 4  ;;  %s2147_s10 = int_to_ptr.vmem [resolvable:$true] %s1336_s10 }
 0x14b   : > { %s1751_s22 = scalar_lea.vmem %s2147_s10, 128 }
 0x14c   : > { %p1752_p11 = scmp.ne.s32.totalorder %s2147_s10, %s1751_s22 }
 0x14d   : > { %526 = vrot.lane.b32.xlu0 %v2068_v11, %s1833_s11 }
 0x14e   : > { %p1753_p1 = pnand %p1752_p11, %p2209_p0 }
 0x150   : > { %p1754_p3 = pneg %p1753_p1 }
 0x1bb   : > { %v361_v13 = vpop.permute.xlu0 %360  ;;  %v525_v15 = vpop.permute.xlu1 %524 }
 0x1bc   : > { %1501 = vmatpush3.xpose.msk.msra.mxu1 %vm362_vm2, %v361_v13 }
 0x1bd   : > { %1505 = vmatprep.subr.mxu1 %v1830_v1 }
 0x1bf   : > { %1503 = vmatmul.mubr.msk.f32.vlgmr.msra.gmra.mrb[0].mxu1 %vm362_vm2, %v2068_v11  ;;  %v527_v14 = vpop.permute.xlu0 %526 }
 0x1c0   : > { %1511 = vmatpush3.xpose.msk.msra.mxu0 %vm362_vm2, %v527_v14  ;;  %1507 = vmatprep.mubr.msk.f32.mxu1 %vm1829_vm0, %v1830_v1 }
 0x1c1   : > { %1520 = vmatprep.subr.mxu0 %v1830_v1 }
 0x1c3   : > { %1513 = vmatmul.mubr.msk.f32.vlgmr.msra.gmra.mrb[2].mxu0 %vm362_vm2, %v525_v15 }
 0x1c4   : > { %1522 = vmatprep.mubr.msk.f32.mxu0 %vm1829_vm0, %v1830_v1  ;;  %1521 = vmatpush3.msra.mxu0 %v356_v32 }
 0x1c5   : > { %1530 = vmatprep.subr.mxu0 %v1830_v1 }
 0x292   : > { %v433_v16 = vpop.f32.mrb[0].mxu1 }
 0x293   : > { %v1504_v17 = vpop.f32.mrb[1].mxu1  ;;  %v437_v18 = vsel %vm362_vm2, %v433_v16, -inf }
 0x294   : > { %438 = vmax.xlane.f32.xlu1 %v437_v18 }
 0x296   : > { %v598_v19 = vpop.f32.mrb[2].mxu0 }
 0x297   : > { %v1514_v20 = vpop.f32.mrb[3].mxu0  ;;  %v602_v21 = vsel %vm362_vm2, %v598_v19, -inf }
 0x298   : > { %603 = vmax.xlane.f32.xlu0 %v602_v21 }
 0x321   : > { %v439_v22 = vpop.xlane.xlu1 %438 }
 0x322   : > { %v440_v23 = vsub.f32 %v433_v16, %v439_v22 }
 0x324   : > { %v441_v24 = vmul.f32 1.442695, %v440_v23 }
 0x325   : > { %v604_v25 = vpop.xlane.xlu0 %603 }
 0x326   : > { %1649 = vpow2.f32 %v441_v24  ;;  %v605_v26 = vsub.f32 %v598_v19, %v604_v25  ;;  %v1455_v25 = vld [vmem:[%s2194_s4] ss:$0 sm:$0xff] }
 0x328   : > { %v606_v27 = vmul.f32 1.442695, %v605_v26 }
 0x32a   : > { %1651 = vpow2.f32 %v606_v27 }
 0x330   : > { %v1650_v28 = vpop.eup %1649 }
 0x331   : > { %v443_v29 = vsel %vm362_vm2, %v1650_v28, 0.0 }
 0x332   : > { %444 = vadd.xlane.f32.xlu0 %v443_v29 }
 0x334   : > { %v1652_v30 = vpop.eup %1651 }
 0x335   : > { %v608_v31 = vsel %vm362_vm2, %v1652_v30, 0.0 }
 0x336   : > { %609 = vadd.xlane.f32.xlu1 %v608_v31 }
 0x347   : > { %613 = vrot.lane.b32.xlu1 %v2068_v11, %s1834_s28 }
 0x348   : > { %448 = vrot.lane.b32.xlu0 %v2068_v11, %s1835_s7  ;;  %s2145_s7 = scalar_lea.hbm %s2195_s5, %s1457_s26 }
 0x34b   : > { %837 = vrot.lane.b32.xlu1 %v2068_v11, %s1836_s6  ;;  %s1323_s6 = scalar_lea.sflag [#allocation4], %s2042_s12 }
 0x34c   : > { %835 = vrot.lane.b32.xlu0 %v2068_v11, %s1837_s30  ;;  %s1755_s30 = sshll.u32 %s1842_s13, 4  ;;  %s1756_s30 = int_to_ptr.vmem [resolvable:$false] %s1755_s30 }
 0x34d   : > { %p1758_p7 = scmp.lt.s32.totalorder %s2147_s10, %s1756_s30 }
 0x3bf   : > { %v445_v33 = vpop.xlane.xlu0 %444 }
 0x3c0   : > { %1653 = vrcp.f32 %v445_v33 }
 0x3c3   : > { %v610_v34 = vpop.xlane.xlu1 %609  ;;  %v449_v35 = vpop.permute.xlu0 %448 }
 0x3c4   : > { %1655 = vrcp.f32 %v610_v34  ;;  %1506 = vmatpush3.msra.mxu1 %v449_v35 }
 0x3c5   : > { %1515 = vmatprep.subr.mxu1 %v1830_v1 }
 0x3c7   : > { %v614_v38 = vpop.permute.xlu1 %613  ;;  %v836_v47 = vpop.permute.xlu0 %835 }
 0x3ca   : > { %v1654_v36 = vpop.eup %1653 }
 0x3cb   : > { %v447_v37 = vmul.f32 %v1654_v36, %v1650_v28  ;;  %v838_v45 = vpop.permute.xlu1 %837 }
 0x3cd   : > { %1508 = vmatmul.mubr.msk.f32.vlgmr.msra.gmra.mrb[2].mxu1 %vm362_vm2, %v447_v37 }
 0x3ce   : > { %v1656_v39 = vpop.eup %1655  ;;  %1516 = vmatpush3.msra.mxu1 %v614_v38  ;;  %1517 = vmatprep.mubr.msk.f32.mxu1 %vm1829_vm0, %v1830_v1 }
 0x3cf   : > { %v612_v40 = vmul.f32 %v1656_v39, %v1652_v30  ;;  %1525 = vmatprep.subr.mxu1 %v1830_v1 }
 0x3d1   : > { %1518 = vmatmul.mubr.msk.f32.vlgmr.msra.gmra.mrb[4].mxu1 %vm362_vm2, %v612_v40 }
 0x3d2   : > { %1527 = vmatprep.mubr.msk.f32.mxu1 %vm1829_vm0, %v1830_v1  ;;  %1526 = vmatpush3.msra.mxu1 %v355_v41 }
 0x3d3   : > { %1535 = vmatprep.subr.mxu1 %v1830_v1 }
 0x4a0   : > { %v520_v42 = vpop.f32.mrb[2].mxu1 }
 0x4a1   : > { %v1509_v43 = vpop.f32.mrb[3].mxu1  ;;  %1528 = vmatmul.mubr.msk.f32.vlgmr.msra.gmra.mrb[6].mxu1 %vm362_vm2, %v520_v42 }
 0x4a2   : > { %1537 = vmatprep.mubr.msk.f32.mxu1 %vm1829_vm0, %v1830_v1 }
 0x4a4   : > { %v685_v44 = vpop.f32.mrb[4].mxu1 }
 0x4a5   : > { %v1519_v46 = vpop.f32.mrb[5].mxu1  ;;  %1523 = vmatmul.mubr.msk.f32.vlgmr.msra.gmra.mrb[4].mxu0 %vm362_vm2, %v685_v44 }
 0x4a6   : > { %1531 = vmatpush3.xpose.msk.msra.mxu0 %vm362_vm2, %v838_v45  ;;  %1532 = vmatprep.mubr.msk.f32.mxu0 %vm1829_vm0, %v1830_v1 }
 0x4a7   : > { %1540 = vmatprep.subr.mxu0 %v1830_v1 }
 0x4a9   : > { %1533 = vmatmul.mubr.msk.f32.vlgmr.msra.gmra.mrb[6].mxu0 %vm362_vm2, %v836_v47 }
 0x4aa   : > { %1542 = vmatprep.mubr.msk.f32.mxu0 %vm1829_vm0, %v1830_v1  ;;  %1541 = vmatpush3.msra.mxu0 %v357_v4 }
 0x4ab   : > { %1550 = vmatprep.subr.mxu0 %v1830_v1 }
 0x574   : > { %v831_v48 = vpop.f32.mrb[6].mxu1 }
 0x575   : > { %v1529_v49 = vpop.f32.mrb[7].mxu1 }
 0x578   : > { %v758_v50 = vpop.f32.mrb[4].mxu0 }
 0x579   : > { %v832_v51 = vadd.f32 %v831_v48, %v758_v50  ;;  %v1524_v52 = vpop.f32.mrb[5].mxu0 }
 0x57c   : > { %v909_v53 = vpop.f32.mrb[6].mxu0 }
 0x57d   : > { %v1534_v54 = vpop.f32.mrb[7].mxu0  ;;  %v913_v55 = vsel %vm362_vm2, %v909_v53, -inf }
 0x57e   : > { %914 = vmax.xlane.f32.xlu1 %v913_v55 }
 0x58f   : > { %1076 = vrot.lane.b32.xlu1 %v2068_v11, %s1838_s15  ;;  %s1757_s15 = scalar_lea.vmem %s1756_s30, 256 }
 0x590   : > { %p1759_p9 = scmp.lt.s32.totalorder %s1757_s15, %s1751_s22 }
 0x592   : > { %p1760_p12 = por %p1759_p9, %p1758_p7 }
 0x593   : > { %1074 = vrot.lane.b32.xlu1 %v2068_v11, %s1839_s16 }
 0x594   : > { %p1761_p2 = pnand %p1760_p12, %p1754_p3 }
 0x60b   : > { %v915_v56 = vpop.xlane.xlu1 %914 }
 0x60c   : > { %v916_v57 = vsub.f32 %v909_v53, %v915_v56 }
 0x60e   : > { %v917_v58 = vmul.f32 1.442695, %v916_v57 }
 0x60f   : > { %v1077_v0 = vpop.permute.xlu1 %1076 }
 0x610   : > { %1657 = vpow2.f32 %v917_v58 }
 0x613   : > { %v1075_v3 = vpop.permute.xlu1 %1074 }
 0x61a   : > { %v1658_v59 = vpop.eup %1657 }
 0x61b   : > { %v919_v60 = vsel %vm362_vm2, %v1658_v59, 0.0 }
 0x61c   : > { %920 = vadd.xlane.f32.xlu0 %v919_v60 }
 0x632   : > { %924 = vrot.lane.b32.xlu0 %v2068_v11, %s1840_s9 }
 0x6a9   : > { %v921_v61 = vpop.xlane.xlu0 %920 }
 0x6aa   : > { %1659 = vrcp.f32 %v921_v61 }
 0x6ad   : > { %v925_v62 = vpop.permute.xlu0 %924 }
 0x6ae   : > { %1536 = vmatpush3.msra.mxu1 %v925_v62 }
 0x6af   : > { %1545 = vmatprep.subr.mxu1 %v1830_v1 }
 0x6b4   : > { %v1660_v63 = vpop.eup %1659 }
 0x6b5   : > { %v923_v2 = vmul.f32 %v1660_v63, %v1658_v59 }
 0x6b7   : > { %1538 = vmatmul.mubr.msk.f32.vlgmr.msra.gmra.mrb[8].mxu1 %vm362_vm2, %v923_v2 }
 0x6b8   : > { %1546 = vmatpush3.xpose.msk.msra.mxu1 %vm362_vm2, %v1077_v0  ;;  %1547 = vmatprep.mubr.msk.f32.mxu1 %vm1829_vm0, %v1830_v1 }
 0x6b9   : > { %1555 = vmatprep.subr.mxu1 %v1830_v1 }
 0x6bb   : > { %1548 = vmatmul.mubr.msk.f32.vlgmr.msra.gmra.mrb[10].mxu1 %vm362_vm2, %v1075_v3 }
 0x6bc   : > { %1557 = vmatprep.mubr.msk.f32.mxu1 %vm1829_vm0, %v1830_v1 }
 0x78a   : > { %v996_v5 = vpop.f32.mrb[8].mxu1 }
 0x78b   : > { %v1539_v6 = vpop.f32.mrb[9].mxu1  ;;  %1543 = vmatmul.mubr.msk.f32.vlgmr.msra.gmra.mrb[8].mxu0 %vm362_vm2, %v996_v5 }
 0x78c   : > { %1552 = vmatprep.mubr.msk.f32.mxu0 %vm1829_vm0, %v1830_v1  ;;  %v358_v1 = vld [vmem:[#allocation7 + $0x18] sm:$0xff] }
 0x78d   : > { %1556 = vmatpush3.msra.mxu1 %v358_v1 }
 0x78e   : > { %v1148_v7 = vpop.f32.mrb[10].mxu1 }
 0x78f   : > { %v1549_v8 = vpop.f32.mrb[11].mxu1  ;;  %v1152_v9 = vsel %vm362_vm2, %v1148_v7, -inf }
 0x790   : > { %1153 = vmax.xlane.f32.xlu0 %v1152_v9 }
 0x7a6   : > { %1163 = vrot.lane.b32.xlu0 %v2068_v11, %s1841_s29 }
 0x81d   : > { %v1154_v10 = vpop.xlane.xlu0 %1153 }
 0x81e   : > { %v1155_v12 = vsub.f32 %v1148_v7, %v1154_v10 }
 0x820   : > { %v1156_v13 = vmul.f32 1.442695, %v1155_v12 }
 0x821   : > { %v1164_v14 = vpop.permute.xlu0 %1163 }
 0x822   : > { %1661 = vpow2.f32 %v1156_v13  ;;  %1551 = vmatpush3.msra.mxu0 %v1164_v14 }
 0x82c   : > { %v1662_v15 = vpop.eup %1661 }
 0x82d   : > { %v1158_v16 = vsel %vm362_vm2, %v1662_v15, 0.0 }
 0x82e   : > { %1159 = vadd.xlane.f32.xlu1 %v1158_v16 }
 0x85e   : > { %v1069_v17 = vpop.f32.mrb[8].mxu0 }
 0x85f   : > { %v1073_v18 = vadd.f32 %v1069_v17, %v832_v51  ;;  %v1544_v19 = vpop.f32.mrb[9].mxu0 }
 0x8bb   : > { %v1160_v20 = vpop.xlane.xlu1 %1159 }
 0x8bc   : > { %1663 = vrcp.f32 %v1160_v20 }
 0x8c6   : > { %v1664_v11 = vpop.eup %1663 }
 0x8c7   : > { %v1162_v21 = vmul.f32 %v1664_v11, %v1662_v15 }
 0x8c9   : > { %1553 = vmatmul.mubr.msk.f32.vlgmr.msra.gmra.mrb[10].mxu0 %vm362_vm2, %v1162_v21 }
 0x99c   : > { %v1235_v22 = vpop.f32.mrb[10].mxu0 }
 0x99d   : > { %v1554_v23 = vpop.f32.mrb[11].mxu0  ;;  %1558 = vmatmul.mubr.msk.f32.vlgmr.msra.gmra.mrb[12].mxu1 %vm362_vm2, %v1235_v22 }
 0xa70   : > { %v1308_v24 = vpop.f32.mrb[12].mxu1 }
 0xa71   : > { %v1312_v26 = vadd.f32 %v1308_v24, %v1073_v18  ;;  %v1559_v27 = vpop.f32.mrb[13].mxu1 }
 0xa73   : > { %v1320_v28 = vadd.f32 %v1455_v25, %v1312_v26 }
 0xa75   : > { %1321 = vst.msk [vmem:[%s268_s8] sm:$0xff] %vm281_vm1, %v1320_v28 }
 0xa76   : > { %1764 = shalt.err (!%p1761_p2)
}
 0xa77   : > { %s1765_s12 = scalar_lea.hbm %s2145_s7, 128  ;;  %s1769_s29 = scalar_lea.hbm %s2195_s5, 256 }
 0xa78   : > { %p1766_p13 = scmp.ne.s32.totalorder %s2145_s7, %s1765_s12  ;;  %p1770_p4 = scmp.lt.u32.totalorder %s2145_s7, %s2195_s5 }
 0xa79   : > { %p1771_p5 = scmp.lt.u32.totalorder %s1769_s29, %s1765_s12  ;;  %p1773_p11 = scmp.lt.u32.totalorder %s1765_s12, %s2145_s7 }
 0xa7a   : > { %p1767_p6 = pnand %p1766_p13, %p2209_p0 }
 0xa7b   : > { %p1772_p8 = por %p1771_p5, %p1770_p4 }
 0xa7c   : > { %p1768_p10 = pneg %p1767_p6 }
 0xa7d   : > { %p1774_p1 = por %p1773_p11, %p1772_p8 }
 0xa7f   : > { %p1775_p3 = pnand %p1774_p1, %p1768_p10 }
 0xa81   : > { %1778 = shalt.err (!%p1775_p3)
}
 0xa82   : > { %1576 = dma.vmem_to_hbm [thread:$0]  (%p2209_p0), %s2147_s10, 128, %s2145_s7, %s1323_s6  }
 0xa83 PF: > { %s1348_s26 = sand.u32 1, %s1809_s18   ;;  %p2210_p7 = scmp.ne.s32.totalorder %s2200_s25, 0 }
 0xa84   : > { %p2211_p9 = scmp.ge.s32.totalorder %s1821_s21, 2  ;;  %s1349_s8 = scalar_lea.sflag [#allocation4], %s1348_s26 }
 0xa86   : > { %p1590_p12 = pnand %p2211_p9, %p2210_p7 }
 0xa88   : > { %1804 = dma.done.wait (!%p1590_p12), %s1349_s8, 128  }
 0xa89   : > { %1806 = vsyncadd (!%p1590_p12), %s1349_s8, 4294967168  ;;  %p19_p2 = scmp.ge.s32.totalorder %s1983_s14, 4   ;;  %s2212_s18 = smov %s1813_s19 }
 0xa8a   : > { %s2213_s19 = smov %s1817_s20  ;;  %s2214_s20 = smov %s1999_s27 }
 0xa8b   : > { %s2215_s21 = smov %s1983_s14  ;;  %21 = sbr.rel (!%p19_p2) target bundleno = 6 (0x6), region = 93 }
 0xa92   :  { %1354 = vsyncpa [#allocation3], 1 }
 0xa93   :  { %1356 = vsyncpa [#allocation3 + $0x1], 1 }
 0xa94   :  { %1357 = vsyncpa [#allocation6], 1 }
 0xa95   :  { %1358 = vsyncpa [#allocation4], 1 }
 0xa96   :  { %1360 = vsyncpa [#allocation4 + $0x1], 1 }

</bundles_post_ra>
